<compile_context>
chip_gen: v6e
topology: v6e:2x2x1
jax: 0.10.0
libtpu: 0.0.40
codegen_flags: <defaults>
</compile_context>

<pallas_src>
import functools

import numpy as np
import jax
import jax.numpy as jnp
from jax.experimental import pallas as pl
from jax.experimental.pallas import tpu as pltpu


def _round_up(v, m):
    return ((v + m - 1) // m) * m


# ---------------------------------------------------------------------------
# Kernel
# ---------------------------------------------------------------------------
def graph_fc_kernel(x_ref, wa_ref, wv_ref, wf_ref, whead_ref, pvec_ref,
                    out_ref, *, has_vf, n_audio):
    tm = out_ref.shape[0]            # node-tile rows
    C = wa_ref.shape[1]              # channels

    # packed params: rows 0..6 = ba, bv, bf, sa, ta, sv, tv ; row 7 = head bias
    pvec = pvec_ref[...]             # (8, C) f32
    ba, bv, bf = pvec[0:1], pvec[1:2], pvec[2:3]
    sa, ta = pvec[3:4], pvec[4:5]
    sv, tv = pvec[5:6], pvec[6:7]
    bhead = pvec[7:8, :8]            # (1, 8)

    a0 = x_ref[0]                    # (TM, F) bf16 slot-0 audio features
    v1 = x_ref[1]                    # (TM, F) bf16 slot-1 video features

    # layer_0_a applied once; (a0 * sim) @ Wa == sim * (a0 @ Wa) since sim is a
    # per-row scalar.
    z0 = jnp.dot(a0, wa_ref[...], preferred_element_type=jnp.float32)  # (TM, C)

    if has_vf:
        # cosine similarity (eps = 1e-8 clamp on each norm), f32 math, EUP rsqrt
        vfa = x_ref[2].astype(jnp.float32)     # vf cols >= in_vf zeroed on host
        vfv = x_ref[3].astype(jnp.float32)
        dotp = jnp.sum(vfa * vfv, axis=-1, keepdims=True)
        na2 = jnp.sum(vfa * vfa, axis=-1, keepdims=True)
        nv2 = jnp.sum(vfv * vfv, axis=-1, keepdims=True)
        eps2 = jnp.float32(1e-16)              # (1e-8)**2
        sim = (dotp
               * jax.lax.rsqrt(jnp.maximum(na2, eps2))
               * jax.lax.rsqrt(jnp.maximum(nv2, eps2)))
        h_a = jnp.maximum(sim * z0 + ba, 0.0)  # relu(layer_0_a(a0 * sim))
    else:
        h_a = jnp.maximum(z0 + ba, 0.0)        # relu(layer_0_a(a0))

    # audio branch: BN_a folded into scale/shift
    ya = (z0 + ba) * sa + ta

    # video branch: BN_v(av_fusion([h_a ; h_v])) without the lane concat
    h_v = jnp.maximum(
        jnp.dot(v1, wv_ref[...], preferred_element_type=jnp.float32) + bv, 0.0)
    wf = wf_ref[...]                           # (2C, C), tiny
    fused = (jnp.dot(h_a, wf[:C], preferred_element_type=jnp.float32)
             + jnp.dot(h_v, wf[C:], preferred_element_type=jnp.float32)
             + bf)
    yv = fused * sv + tv

    # per-node select (nodes are audio-first ordered), relu, fused head (C -> 8)
    row = (pl.program_id(0) * tm
           + jax.lax.broadcasted_iota(jnp.int32, (tm, 1), 0))
    gf = jnp.maximum(jnp.where(row < n_audio, ya, yv), 0.0)
    out_ref[...] = (jnp.dot(gf, whead_ref[...],
                            preferred_element_type=jnp.float32) + bhead)


# ---------------------------------------------------------------------------
# Parameter init (mirrors the PyTorch module layout: Linear [out, in])
# ---------------------------------------------------------------------------
def init_params(key, in_a, in_v, in_vf, channels):
    ks = jax.random.split(key, 16)

    def lin(k, fan_in, fan_out):
        kw, kb = jax.random.split(k)
        w = jax.random.normal(kw, (fan_out, fan_in), jnp.float32) * 0.05
        b = jax.random.normal(kb, (fan_out,), jnp.float32) * 0.05
        return (w, b)

    def bn(k, c):
        k1, k2, k3, k4 = jax.random.split(k, 4)
        gamma = 1.0 + 0.1 * jax.random.normal(k1, (c,), jnp.float32)
        beta = 0.1 * jax.random.normal(k2, (c,), jnp.float32)
        mean = 0.05 * jax.random.normal(k3, (c,), jnp.float32)
        var = 1.0 + 0.1 * jax.random.uniform(k4, (c,), jnp.float32)
        return (gamma, beta, mean, var)

    return {
        "in_a": in_a, "in_v": in_v, "in_vf": in_vf, "channels": channels,
        "layer_0_a": lin(ks[0], in_a, channels),
        "layer_0_v": lin(ks[1], in_v, channels),
        "av_fusion": lin(ks[2], channels * 2, channels),
        "bn_a": bn(ks[3], channels),
        "bn_v": bn(ks[4], channels),
        "fc_a": lin(ks[5], channels, 2),
        "fc_v": lin(ks[6], channels, 2),
        "fc": lin(ks[7], channels, 2),
    }


# ---------------------------------------------------------------------------
# Host wrapper
# ---------------------------------------------------------------------------
def graph_fc_net(x, audio_node_mask, params):
    # flatten nested mask lists (mirrors the PyTorch branch)
    if isinstance(audio_node_mask[0], (list, tuple)):
        flat = []
        for m in audio_node_mask:
            flat += list(m)
        audio_node_mask = flat

    N, S, F = x.shape
    in_a, in_v, in_vf, C = (params["in_a"], params["in_v"],
                            params["in_vf"], params["channels"])
    assert C >= 8, "fused head packs 6 logits into 8 lanes; needs channels >= 8"
    has_vf = S > 3
    S_used = 4 if has_vf else 2

    mask_np = np.asarray(audio_node_mask, dtype=bool)
    n_audio = int(mask_np.sum())

    # static audio-first node permutation (stable -> preserves relative order)
    perm = np.argsort(~mask_np, kind="stable")
    inv_perm = np.argsort(perm, kind="stable")

    # ---- node tiling: weights resident, node tiles pipelined over the grid.
    # Keep an even tile count (>=2) when N is large enough so v7x's 2 TCs both
    # get work; cap TM at 2048 so buffers fit v7x's 64 MiB VMEM.
    cap = 2048
    if N <= 256:
        num_tiles = 1
    else:
        num_tiles = max(2, -(-N // cap))
        num_tiles += num_tiles % 2
    TM = _round_up(-(-N // num_tiles), 16)
    N_pad = TM * num_tiles

    # ---- activation slab: bf16, audio-first order, (S_used, N_pad, F).
    # vf columns >= in_vf are zeroed here (folded into the prep pass) so the
    # kernel needs no keep-mask.  The slice/stack/cast/gather/pad fuses into a
    # single producer pass in XLA; unused slots (S <= 3) are never materialised.
    xs = x.astype(jnp.bfloat16)[jnp.asarray(perm)]          # (N, S, F)
    slots = [xs[:, 0, :], xs[:, 1, :]]
    if has_vf:
        if in_vf < F:
            keep = jnp.asarray(np.arange(F) < in_vf, jnp.bfloat16)
            slots += [xs[:, 2, :] * keep, xs[:, 3, :] * keep]
        else:
            slots += [xs[:, 2, :], xs[:, 3, :]]
    xt = jnp.stack(slots, axis=0)                            # (S_used, N, F)
    if N_pad != N:
        xt = jnp.pad(xt, ((0, 0), (0, N_pad - N), (0, 0)))

    # ---- weights: zero-padded rows fold the ':in_a' / ':in_v' column slices ----
    wa = jnp.zeros((F, C), jnp.float32).at[:in_a].set(params["layer_0_a"][0].T)
    wv = jnp.zeros((F, C), jnp.float32).at[:in_v].set(params["layer_0_v"][0].T)
    wf = params["av_fusion"][0].T                            # (2C, C)
    whead = jnp.concatenate(                                 # (C, 8) fused heads
        [params["fc"][0].T, params["fc_a"][0].T, params["fc_v"][0].T,
         jnp.zeros((C, 2), jnp.float32)], axis=1)

    # ---- fold BatchNorm (inference) into scale / shift; pack param slab ----
    def bn_fold(gamma, beta, mean, var, eps=1e-5):
        s = gamma / jnp.sqrt(var + eps)
        return s.reshape(1, -1), (beta - mean * s).reshape(1, -1)

    sa, ta = bn_fold(*params["bn_a"])
    sv, tv = bn_fold(*params["bn_v"])
    ba = params["layer_0_a"][1].reshape(1, C)
    bv = params["layer_0_v"][1].reshape(1, C)
    bf = params["av_fusion"][1].reshape(1, C)
    bhead = jnp.zeros((1, C), jnp.float32).at[0, :6].set(
        jnp.concatenate([params["fc"][1], params["fc_a"][1], params["fc_v"][1]]))
    pvec = jnp.concatenate([ba, bv, bf, sa, ta, sv, tv, bhead], axis=0)  # (8, C)

    # ---- specs ----
    x_spec = pl.BlockSpec((S_used, TM, F), lambda i: (0, i, 0))

    def full2d(shape):
        return pl.BlockSpec(shape, lambda i: (0, 0))

    out_spec = pl.BlockSpec((TM, 8), lambda i: (i, 0))

    # ---- VMEM budget from actual (lane-padded) buffers, capped for v7x ----
    lane = 128
    f_pad = _round_up(F, lane)
    c_pad = _round_up(C, lane)
    x_buf = 2 * S_used * TM * f_pad * 2          # bf16, double-buffered
    out_buf = 2 * TM * lane * 4                  # (TM, 8) pads to 128 lanes
    temps = 10 * TM * c_pad * 4                  # live f32 (TM, C) intermediates
    w_buf = 2 * 4 * (3 * f_pad * c_pad + c_pad * lane + 8 * c_pad)
    vmem_limit = min(48 * 1024 * 1024,
                     max(32 * 1024 * 1024,
                         int(1.5 * (x_buf + out_buf + temps + w_buf))
                         + (1 << 20)))

    # ---- cost hint ----
    mm_flops = 2 * N_pad * (2 * F * C + 2 * C * C + 8 * C)
    ew_flops = 8 * N_pad * F if has_vf else 0
    cost = pl.CostEstimate(
        flops=mm_flops + ew_flops,
        transcendentals=(2 * N_pad if has_vf else 0),
        bytes_accessed=(2 * S_used * N_pad * F
                        + 4 * (2 * F * C + 2 * C * C + 8 * C + 8 * C)
                        + 4 * N_pad * 8))

    kernel = functools.partial(graph_fc_kernel, has_vf=has_vf, n_audio=n_audio)

    heads = pl.pallas_call(
        kernel,
        out_shape=jax.ShapeDtypeStruct((N_pad, 8), jnp.float32),
        grid=(num_tiles,),
        in_specs=[x_spec, full2d((F, C)), full2d((F, C)), full2d((2 * C, C)),
                  full2d((C, 8)), full2d((8, C))],
        out_specs=out_spec,
        compiler_params=pltpu.CompilerParams(
            dimension_semantics=("parallel",),
            vmem_limit_bytes=vmem_limit),
        cost_estimate=cost,
    )(xt, wa, wv, wf, whead, pvec)

    heads = heads[:N]                              # audio-first node order
    out = heads[jnp.asarray(inv_perm), 0:2]        # back to original order
    audio_out = heads[:n_audio, 2:4]
    video_out = heads[n_audio:, 4:6]
    return out, audio_out, video_out


# ---------------------------------------------------------------------------
# Pure-JAX reference (mirrors the PyTorch forward, inference-mode BN)
# ---------------------------------------------------------------------------
def _reference(x, mask_np, params):
    in_a, in_v, in_vf, C = (params["in_a"], params["in_v"],
                            params["in_vf"], params["channels"])
    N, S, _ = x.shape
    audio_idx = np.nonzero(mask_np)[0]
    video_idx = np.nonzero(~mask_np)[0]

    def lin(p, z):
        w, b = p
        return z @ w.T + b

    def bn(p, z, eps=1e-5):
        g, be, m, v = p
        return (z - m) / jnp.sqrt(v + eps) * g + be

    audio_feats = x[audio_idx, 0, :in_a]
    va_feats = x[video_idx, 0, :in_a]
    v_feats = x[video_idx, 1, :in_v]
    if S > 3:
        a_vf = x[video_idx, 2, :in_vf]
        v_vf = x[video_idx, 3, :in_vf]
        eps = 1e-8
        num = jnp.sum(a_vf * v_vf, -1)
        den = (jnp.maximum(jnp.sqrt(jnp.sum(a_vf * a_vf, -1)), eps)
               * jnp.maximum(jnp.sqrt(jnp.sum(v_vf * v_vf, -1)), eps))
        va_feats = va_feats * (num / den)[:, None]

    gf = jnp.zeros((N, C), jnp.float32)
    gf = gf.at[audio_idx].set(bn(params["bn_a"], lin(params["layer_0_a"], audio_feats)))
    h = jnp.concatenate([jax.nn.relu(lin(params["layer_0_a"], va_feats)),
                         jax.nn.relu(lin(params["layer_0_v"], v_feats))], axis=1)
    gf = gf.at[video_idx].set(bn(params["bn_v"], lin(params["av_fusion"], h)))
    gf = jax.nn.relu(gf)
    return (lin(params["fc"], gf),
            lin(params["fc_a"], gf[audio_idx]),
            lin(params["fc_v"], gf[video_idx]))


if __name__ == "__main__":
    in_a, in_v, in_vf, channels = 64, 64, 32, 32
    N, S = 8, 4
    F = max(in_a, in_v, in_vf)

    key = jax.random.PRNGKey(0)
    kx, kp = jax.random.split(key)
    x = jax.random.normal(kx, (N, S, F), jnp.float32)
    audio_node_mask = [True, False, True, False, False, True, False, False]
    mask_np = np.asarray(audio_node_mask, bool)
    n_audio = int(mask_np.sum())

    params = init_params(kp, in_a, in_v, in_vf, channels)

    # ---- run with vf slots (S = 4) ----
    out, audio_out, video_out = graph_fc_net(x, audio_node_mask, params)
    jax.block_until_ready((out, audio_out, video_out))

    assert out.shape == (N, 2)
    assert audio_out.shape == (n_audio, 2)
    assert video_out.shape == (N - n_audio, 2)

    # kernel math check: reference fed the same bf16-quantized activations
    x_q = x.astype(jnp.bfloat16).astype(jnp.float32)
    ref_out, ref_a, ref_v = _reference(x_q, mask_np, params)
    assert jnp.allclose(out, ref_out, atol=2e-3, rtol=2e-3)
    assert jnp.allclose(audio_out, ref_a, atol=2e-3, rtol=2e-3)
    assert jnp.allclose(video_out, ref_v, atol=2e-3, rtol=2e-3)

    # end-to-end check vs full-f32 reference (bf16 activation quantization)
    ref_out32, ref_a32, ref_v32 = _reference(x, mask_np, params)
    assert jnp.allclose(out, ref_out32, atol=2e-2, rtol=2e-2)
    assert jnp.allclose(audio_out, ref_a32, atol=2e-2, rtol=2e-2)
    assert jnp.allclose(video_out, ref_v32, atol=2e-2, rtol=2e-2)

    # ---- run without vf slots (S = 2 path, slots 2-3 never DMA'd) ----
    x2 = x[:, :2, :]
    out2, audio_out2, video_out2 = graph_fc_net(x2, audio_node_mask, params)
    jax.block_until_ready((out2, audio_out2, video_out2))
    ref_out2, ref_a2, ref_v2 = _reference(x2.astype(jnp.bfloat16).astype(jnp.float32),
                                          mask_np, params)
    assert jnp.allclose(out2, ref_out2, atol=2e-3, rtol=2e-3)
    assert jnp.allclose(audio_out2, ref_a2, atol=2e-3, rtol=2e-3)
    assert jnp.allclose(video_out2, ref_v2, atol=2e-3, rtol=2e-3)

    print("KERNEL_OK")
</pallas_src>

<mosaic_0001>
module attributes {stable_mosaic.version = 11 : i64} {
  func.func @graph_fc_kernel(%arg0: i32, %arg1: memref<4x16x64xbf16, #tpu.memory_space<vmem>>, %arg2: memref<64x32xf32, #tpu.memory_space<vmem>>, %arg3: memref<64x32xf32, #tpu.memory_space<vmem>>, %arg4: memref<64x32xf32, #tpu.memory_space<vmem>>, %arg5: memref<32x8xf32, #tpu.memory_space<vmem>>, %arg6: memref<8x32xf32, #tpu.memory_space<vmem>>, %arg7: memref<16x8xf32, #tpu.memory_space<vmem>>) attributes {dimension_semantics = [#tpu.dimension_semantics<parallel>], iteration_bounds = array<i64: 1>, scalar_prefetch = 0 : i64, scratch_operands = 0 : i64, tpu.core_type = #tpu.core_type<tc>, window_params = [{transform_indices = @transform_0, window_bounds = array<i64: 4, 16, 64>}, {pipeline_mode = #tpu.pipeline_mode<synchronous>, transform_indices = @transform_1, window_bounds = array<i64: 64, 32>}, {pipeline_mode = #tpu.pipeline_mode<synchronous>, transform_indices = @transform_2, window_bounds = array<i64: 64, 32>}, {pipeline_mode = #tpu.pipeline_mode<synchronous>, transform_indices = @transform_3, window_bounds = array<i64: 64, 32>}, {pipeline_mode = #tpu.pipeline_mode<synchronous>, transform_indices = @transform_4, window_bounds = array<i64: 32, 8>}, {pipeline_mode = #tpu.pipeline_mode<synchronous>, transform_indices = @transform_5, window_bounds = array<i64: 8, 32>}, {transform_indices = @transform_6, window_bounds = array<i64: 16, 8>}]} {
    %c0 = arith.constant 0 : index
    %c0_0 = arith.constant 0 : index
    %0 = vector.load %arg6[%c0, %c0_0] : memref<8x32xf32, #tpu.memory_space<vmem>>, vector<8x32xf32>
    %1 = vector.extract_strided_slice %0 {offsets = [0, 0], sizes = [1, 32], strides = [1, 1]} : vector<8x32xf32> to vector<1x32xf32>
    %2 = vector.extract_strided_slice %0 {offsets = [1, 0], sizes = [1, 32], strides = [1, 1]} : vector<8x32xf32> to vector<1x32xf32>
    %3 = vector.extract_strided_slice %0 {offsets = [2, 0], sizes = [1, 32], strides = [1, 1]} : vector<8x32xf32> to vector<1x32xf32>
    %4 = vector.extract_strided_slice %0 {offsets = [3, 0], sizes = [1, 32], strides = [1, 1]} : vector<8x32xf32> to vector<1x32xf32>
    %5 = vector.extract_strided_slice %0 {offsets = [4, 0], sizes = [1, 32], strides = [1, 1]} : vector<8x32xf32> to vector<1x32xf32>
    %6 = vector.extract_strided_slice %0 {offsets = [5, 0], sizes = [1, 32], strides = [1, 1]} : vector<8x32xf32> to vector<1x32xf32>
    %7 = vector.extract_strided_slice %0 {offsets = [6, 0], sizes = [1, 32], strides = [1, 1]} : vector<8x32xf32> to vector<1x32xf32>
    %8 = vector.extract_strided_slice %0 {offsets = [7, 0], sizes = [1, 8], strides = [1, 1]} : vector<8x32xf32> to vector<1x8xf32>
    %c0_1 = arith.constant 0 : index
    %c0_2 = arith.constant 0 : index
    %c0_3 = arith.constant 0 : index
    %9 = vector.load %arg1[%c0_1, %c0_2, %c0_3] : memref<4x16x64xbf16, #tpu.memory_space<vmem>>, vector<1x16x64xbf16>
    %10 = vector.shape_cast %9 : vector<1x16x64xbf16> to vector<16x64xbf16>
    %c1 = arith.constant 1 : index
    %c0_4 = arith.constant 0 : index
    %c0_5 = arith.constant 0 : index
    %11 = vector.load %arg1[%c1, %c0_4, %c0_5] : memref<4x16x64xbf16, #tpu.memory_space<vmem>>, vector<1x16x64xbf16>
    %12 = vector.shape_cast %11 : vector<1x16x64xbf16> to vector<16x64xbf16>
    %c0_6 = arith.constant 0 : index
    %c0_7 = arith.constant 0 : index
    %13 = vector.load %arg2[%c0_6, %c0_7] : memref<64x32xf32, #tpu.memory_space<vmem>>, vector<64x32xf32>
    %cst = arith.constant dense<0.000000e+00> : vector<16x32xf32>
    %14 = tpu.matmul %10, %13, %cst {dimension_numbers = #tpu.dot_dimension_numbers<[1], [0], [0], [1], [0, 0, 1, 1], [], []>} : vector<16x64xbf16>, vector<64x32xf32>, vector<16x32xf32> -> vector<16x32xf32>
    %c2 = arith.constant 2 : index
    %c0_8 = arith.constant 0 : index
    %c0_9 = arith.constant 0 : index
    %15 = vector.load %arg1[%c2, %c0_8, %c0_9] : memref<4x16x64xbf16, #tpu.memory_space<vmem>>, vector<1x16x64xbf16>
    %16 = vector.shape_cast %15 : vector<1x16x64xbf16> to vector<16x64xbf16>
    %17 = arith.extf %16 : vector<16x64xbf16> to vector<16x64xf32>
    %c3 = arith.constant 3 : index
    %c0_10 = arith.constant 0 : index
    %c0_11 = arith.constant 0 : index
    %18 = vector.load %arg1[%c3, %c0_10, %c0_11] : memref<4x16x64xbf16, #tpu.memory_space<vmem>>, vector<1x16x64xbf16>
    %19 = vector.shape_cast %18 : vector<1x16x64xbf16> to vector<16x64xbf16>
    %20 = arith.extf %19 : vector<16x64xbf16> to vector<16x64xf32>
    %21 = arith.mulf %17, %20 : vector<16x64xf32>
    %cst_12 = arith.constant dense<0.000000e+00> : vector<16xf32>
    %22 = vector.multi_reduction <add>, %21, %cst_12 [1] : vector<16x64xf32> to vector<16xf32>
    %23 = vector.shape_cast %22 : vector<16xf32> to vector<16x1xf32>
    %24 = arith.mulf %17, %17 : vector<16x64xf32>
    %cst_13 = arith.constant dense<0.000000e+00> : vector<16xf32>
    %25 = vector.multi_reduction <add>, %24, %cst_13 [1] : vector<16x64xf32> to vector<16xf32>
    %26 = vector.shape_cast %25 : vector<16xf32> to vector<16x1xf32>
    %27 = arith.mulf %20, %20 : vector<16x64xf32>
    %cst_14 = arith.constant dense<0.000000e+00> : vector<16xf32>
    %28 = vector.multi_reduction <add>, %27, %cst_14 [1] : vector<16x64xf32> to vector<16xf32>
    %29 = vector.shape_cast %28 : vector<16xf32> to vector<16x1xf32>
    %cst_15 = arith.constant 1.000000e-16 : f32
    %30 = vector.broadcast %cst_15 : f32 to vector<16x1xf32>
    %31 = arith.maximumf %26, %30 : vector<16x1xf32>
    %32 = math.rsqrt %31 : vector<16x1xf32>
    %33 = arith.mulf %23, %32 : vector<16x1xf32>
    %cst_16 = arith.constant 1.000000e-16 : f32
    %34 = vector.broadcast %cst_16 : f32 to vector<16x1xf32>
    %35 = arith.maximumf %29, %34 : vector<16x1xf32>
    %36 = math.rsqrt %35 : vector<16x1xf32>
    %37 = arith.mulf %33, %36 : vector<16x1xf32>
    %38 = vector.broadcast %37 : vector<16x1xf32> to vector<16x32xf32>
    %39 = arith.mulf %38, %14 : vector<16x32xf32>
    %40 = vector.broadcast %1 : vector<1x32xf32> to vector<16x32xf32>
    %41 = arith.addf %39, %40 : vector<16x32xf32>
    %cst_17 = arith.constant 0.000000e+00 : f32
    %42 = vector.broadcast %cst_17 : f32 to vector<16x32xf32>
    %43 = arith.maximumf %41, %42 : vector<16x32xf32>
    %44 = vector.broadcast %1 : vector<1x32xf32> to vector<16x32xf32>
    %45 = arith.addf %14, %44 : vector<16x32xf32>
    %46 = vector.broadcast %4 : vector<1x32xf32> to vector<16x32xf32>
    %47 = arith.mulf %45, %46 : vector<16x32xf32>
    %48 = vector.broadcast %5 : vector<1x32xf32> to vector<16x32xf32>
    %49 = arith.addf %47, %48 : vector<16x32xf32>
    %c0_18 = arith.constant 0 : index
    %c0_19 = arith.constant 0 : index
    %50 = vector.load %arg3[%c0_18, %c0_19] : memref<64x32xf32, #tpu.memory_space<vmem>>, vector<64x32xf32>
    %cst_20 = arith.constant dense<0.000000e+00> : vector<16x32xf32>
    %51 = tpu.matmul %12, %50, %cst_20 {dimension_numbers = #tpu.dot_dimension_numbers<[1], [0], [0], [1], [0, 0, 1, 1], [], []>} : vector<16x64xbf16>, vector<64x32xf32>, vector<16x32xf32> -> vector<16x32xf32>
    %52 = vector.broadcast %2 : vector<1x32xf32> to vector<16x32xf32>
    %53 = arith.addf %51, %52 : vector<16x32xf32>
    %cst_21 = arith.constant 0.000000e+00 : f32
    %54 = vector.broadcast %cst_21 : f32 to vector<16x32xf32>
    %55 = arith.maximumf %53, %54 : vector<16x32xf32>
    %c0_22 = arith.constant 0 : index
    %c0_23 = arith.constant 0 : index
    %56 = vector.load %arg4[%c0_22, %c0_23] : memref<64x32xf32, #tpu.memory_space<vmem>>, vector<64x32xf32>
    %57 = vector.extract_strided_slice %56 {offsets = [0, 0], sizes = [32, 32], strides = [1, 1]} : vector<64x32xf32> to vector<32x32xf32>
    %cst_24 = arith.constant dense<0.000000e+00> : vector<16x32xf32>
    %58 = tpu.matmul %43, %57, %cst_24 {dimension_numbers = #tpu.dot_dimension_numbers<[1], [0], [0], [1], [0, 0, 1, 1], [], []>} : vector<16x32xf32>, vector<32x32xf32>, vector<16x32xf32> -> vector<16x32xf32>
    %59 = vector.extract_strided_slice %56 {offsets = [32, 0], sizes = [32, 32], strides = [1, 1]} : vector<64x32xf32> to vector<32x32xf32>
    %cst_25 = arith.constant dense<0.000000e+00> : vector<16x32xf32>
    %60 = tpu.matmul %55, %59, %cst_25 {dimension_numbers = #tpu.dot_dimension_numbers<[1], [0], [0], [1], [0, 0, 1, 1], [], []>} : vector<16x32xf32>, vector<32x32xf32>, vector<16x32xf32> -> vector<16x32xf32>
    %61 = arith.addf %58, %60 : vector<16x32xf32>
    %62 = vector.broadcast %3 : vector<1x32xf32> to vector<16x32xf32>
    %63 = arith.addf %61, %62 : vector<16x32xf32>
    %64 = vector.broadcast %6 : vector<1x32xf32> to vector<16x32xf32>
    %65 = arith.mulf %63, %64 : vector<16x32xf32>
    %66 = vector.broadcast %7 : vector<1x32xf32> to vector<16x32xf32>
    %67 = arith.addf %65, %66 : vector<16x32xf32>
    %c16_i32 = arith.constant 16 : i32
    %68 = arith.muli %arg0, %c16_i32 : i32
    %69 = tpu.iota {dimensions = array<i32: 0>} : vector<16x1xi32>
    %70 = vector.broadcast %68 : i32 to vector<16x1xi32>
    %71 = arith.addi %70, %69 : vector<16x1xi32>
    %c3_i32 = arith.constant 3 : i32
    %72 = vector.broadcast %c3_i32 : i32 to vector<16x1xi32>
    %73 = arith.cmpi slt, %71, %72 : vector<16x1xi32>
    %74 = vector.shape_cast %73 : vector<16x1xi1> to vector<16x1xi1>
    %75 = vector.broadcast %74 : vector<16x1xi1> to vector<16x32xi1>
    %76 = arith.select %75, %49, %67 : vector<16x32xi1>, vector<16x32xf32>
    %cst_26 = arith.constant 0.000000e+00 : f32
    %77 = vector.broadcast %cst_26 : f32 to vector<16x32xf32>
    %78 = arith.maximumf %76, %77 : vector<16x32xf32>
    %c0_27 = arith.constant 0 : index
    %c0_28 = arith.constant 0 : index
    %79 = vector.load %arg5[%c0_27, %c0_28] : memref<32x8xf32, #tpu.memory_space<vmem>>, vector<32x8xf32>
    %cst_29 = arith.constant dense<0.000000e+00> : vector<16x8xf32>
    %80 = tpu.matmul %78, %79, %cst_29 {dimension_numbers = #tpu.dot_dimension_numbers<[1], [0], [0], [1], [0, 0, 1, 1], [], []>} : vector<16x32xf32>, vector<32x8xf32>, vector<16x8xf32> -> vector<16x8xf32>
    %81 = vector.broadcast %8 : vector<1x8xf32> to vector<16x8xf32>
    %82 = arith.addf %80, %81 : vector<16x8xf32>
    %c0_30 = arith.constant 0 : index
    %c0_31 = arith.constant 0 : index
    %83 = vector.load %arg7[%c0_30, %c0_31] : memref<16x8xf32, #tpu.memory_space<vmem>>, vector<16x8xf32>
    tpu.vector_store %arg7[%c0_30, %c0_31], %82 {strides = array<i32>} : memref<16x8xf32, #tpu.memory_space<vmem>>, vector<16x8xf32>,
    return
  }
  func.func @transform_0(%arg0: i32) -> (i32, i32, i32) {
    %c0_i32 = arith.constant 0 : i32
    %c0_i32_0 = arith.constant 0 : i32
    %c0_i32_1 = arith.constant 0 : i32
    return %c0_i32, %arg0, %c0_i32_0 : i32, i32, i32
  }
  func.func @transform_1(%arg0: i32) -> (i32, i32) {
    %c0_i32 = arith.constant 0 : i32
    %c0_i32_0 = arith.constant 0 : i32
    %c0_i32_1 = arith.constant 0 : i32
    return %c0_i32, %c0_i32_0 : i32, i32
  }
  func.func @transform_2(%arg0: i32) -> (i32, i32) {
    %c0_i32 = arith.constant 0 : i32
    %c0_i32_0 = arith.constant 0 : i32
    %c0_i32_1 = arith.constant 0 : i32
    return %c0_i32, %c0_i32_0 : i32, i32
  }
  func.func @transform_3(%arg0: i32) -> (i32, i32) {
    %c0_i32 = arith.constant 0 : i32
    %c0_i32_0 = arith.constant 0 : i32
    %c0_i32_1 = arith.constant 0 : i32
    return %c0_i32, %c0_i32_0 : i32, i32
  }
  func.func @transform_4(%arg0: i32) -> (i32, i32) {
    %c0_i32 = arith.constant 0 : i32
    %c0_i32_0 = arith.constant 0 : i32
    %c0_i32_1 = arith.constant 0 : i32
    return %c0_i32, %c0_i32_0 : i32, i32
  }
  func.func @transform_5(%arg0: i32) -> (i32, i32) {
    %c0_i32 = arith.constant 0 : i32
    %c0_i32_0 = arith.constant 0 : i32
    %c0_i32_1 = arith.constant 0 : i32
    return %c0_i32, %c0_i32_0 : i32, i32
  }
  func.func @transform_6(%arg0: i32) -> (i32, i32) {
    %c0_i32 = arith.constant 0 : i32
    %c0_i32_0 = arith.constant 0 : i32
    return %arg0, %c0_i32 : i32, i32
  }
}

</mosaic_0001>

<bundles_post_ra>
// kernel: tpu_custom_call.1
= control target key start
LH: loop header
LB: loop body
LE: loop exit
PB: predicated region body
PF: predicated region fallthrough
CT: control target
= control target key end

     0   :  { %v734_v0 = vmov 0.0   ;;  %vm43_vm0 = vcmask 523264   ;;  %vm735_vm1 = vmmov 0   ;;  %v168_v53 = vlaneseq  ;;  %s929_s1 = inlined_call_operand.vmem [shape: f32[64,32], index: 1, kind: input, shape index: {}]   ;;  %s930_s2 = inlined_call_operand.vmem [shape: f32[64,32], index: 2, kind: input, shape index: {}]   ;;  %s931_s0 = inlined_call_operand.vmem [shape: bf16[4,16,64], index: 0, kind: input, shape index: {}]   ;;  %s932_s3 = inlined_call_operand.vmem [shape: f32[64,32], index: 3, kind: input, shape index: {}]   ;;  %s933_s5 = inlined_call_operand.vmem [shape: f32[8,32], index: 5, kind: input, shape index: {}]   ;;  %s934_s4 = inlined_call_operand.vmem [shape: f32[32,8], index: 4, kind: input, shape index: {}]   ;;  %s935_s6 = inlined_call_operand.vmem [shape: f32[16,8], index: 6, kind: output, shape index: {}]  }
   0x1   :  { %649 = vmatprep.subr.mxu0 %v734_v0  ;;  %669 = vmatprep.subr.mxu1 %v734_v0  ;;  %v37_v1 = vld [vmem:[%s929_s1 + $0x38] sm:$0xff]  ;;  %v36_v3 = vld [vmem:[%s929_s1 + $0x30] sm:$0xff]  ;;  %v35_v5 = vld [vmem:[%s929_s1 + $0x28] sm:$0xff]  ;;  %vm293_vm2 = vcmask 261120   ;;  %vm580_vm4 = vcmask 64512  }
   0x2   :  { %v197_v2 = vld [vmem:[%s930_s2 + $0x38] sm:$0xff]  ;;  %650 = vmatpush3.msra.mxu0 %v37_v1  ;;  %v196_v4 = vld [vmem:[%s930_s2 + $0x30] sm:$0xff]  ;;  %v195_v6 = vld [vmem:[%s930_s2 + $0x28] sm:$0xff]  ;;  %665 = vmatprep.mubr.msk.bf16.mxu0 %vm735_vm1, %v734_v0  ;;  %v881_v54 = vshrl.u32 %v168_v53, 7 }
   0x3   :  { %670 = vmatpush3.msra.mxu1 %v197_v2  ;;  %651 = vmatprep.subr.mxu0 %v734_v0  ;;  %v34_v7 = vld [vmem:[%s929_s1 + $0x20] sm:$0xff]  ;;  %v33_v9 = vld [vmem:[%s929_s1 + $0x18] sm:$0xff]  ;;  %v611_v11 = vld [vmem:[%s931_s0 + $0x10] sm:$0xff]  }
   0x4   :  { %671 = vmatprep.subr.mxu1 %v734_v0  ;;  %652 = vmatpush3.msra.mxu0 %v36_v3  ;;  %v194_v8 = vld [vmem:[%s930_s2 + $0x20] sm:$0xff]  ;;  %v193_v10 = vld [vmem:[%s930_s2 + $0x18] sm:$0xff]  ;;  %v32_v13 = vld [vmem:[%s929_s1 + $0x10] sm:$0xff]  ;;  %v605_v15 = vunpack.c.l.bf16 %v611_v11  ;;  %v606_v21 = vunpack.c.h.bf16 %v611_v11  ;;  %v170_v59 = vsub.s32 0, %v881_v54  ;;  %v200_v60 = vsub.s32 1, %v881_v54 }
   0x5   :  { %672 = vmatpush3.msra.mxu1 %v196_v4  ;;  %653 = vmatprep.subr.mxu0 %v734_v0  ;;  %v612_v12 = vld [vmem:[%s931_s0 + $0x18] sm:$0xff]   ;;  %v192_v14 = vld [vmem:[%s930_s2 + $0x10] sm:$0xff]  ;;  %v31_v17 = vld [vmem:[%s929_s1 + $0x8] sm:$0xff]  ;;  %vm481_vm3 = vcmp.lt.s32.totalorder %v881_v54, 3 }
   0x6   :  { %673 = vmatprep.subr.mxu1 %v734_v0  ;;  %654 = vmatpush3.msra.mxu0 %v35_v5  ;;  %v609_v16 = vunpack.c.l.bf16 %v612_v12  ;;  %v191_v18 = vld [vmem:[%s930_s2 + $0x8] sm:$0xff]  ;;  %v138_v19 = vmul.f32 %v605_v15, %v605_v15  ;;  %v610_v22 = vunpack.c.h.bf16 %v612_v12  ;;  %v30_v23 = vld [vmem:[%s929_s1] sm:$0xff]  ;;  %v139_v29 = vmul.f32 %v606_v21, %v606_v21  ;;  %v292_v37 = vld [vmem:[%s932_s3 + $0x38] sm:$0xff] }
   0x7   :  { %674 = vmatpush3.msra.mxu1 %v195_v6  ;;  %655 = vmatprep.subr.mxu0 %v734_v0  ;;  %v190_v24 = vld [vmem:[%s930_s2] sm:$0xff]  ;;  %v725_v26 = vld [vmem:[%s931_s0 + $0x8] sm:$0xff]   ;;  %v288_v38 = vld [vmem:[%s932_s3 + $0x18] sm:$0xff] }
   0x8   :  { %675 = vmatprep.subr.mxu1 %v734_v0  ;;  %656 = vmatpush3.msra.mxu0 %v34_v7  ;;  %v146_v20 = vmul.f32 %v609_v16, %v609_v16  ;;  %v724_v25 = vld [vmem:[%s931_s0] sm:$0xff]   ;;  %v140_v27 = vsel %vm43_vm0, %v138_v19, 0.0  ;;  %v147_v30 = vmul.f32 %v610_v22, %v610_v22  ;;  %v143_v31 = vsel %vm43_vm0, %v139_v29, 0.0  ;;  %v291_v39 = vld [vmem:[%s932_s3 + $0x30] sm:$0xff]  ;;  %v290_v41 = vld [vmem:[%s932_s3 + $0x28] sm:$0xff] }
   0x9   :  { %676 = vmatpush3.msra.mxu1 %v194_v8  ;;  %657 = vmatprep.subr.mxu0 %v734_v0  ;;  %v130_v33 = vmul.f32 %v609_v16, %v605_v15  ;;  %v131_v34 = vmul.f32 %v610_v22, %v606_v21  ;;  %v287_v40 = vld [vmem:[%s932_s3 + $0x10] sm:$0xff]  ;;  %v286_v42 = vld [vmem:[%s932_s3 + $0x8] sm:$0xff]  ;;  %v289_v43 = vld [vmem:[%s932_s3 + $0x20] sm:$0xff]  ;;  %v458_v29 = vsub.s32 2, %v881_v54 }
   0xa   :  { %677 = vmatprep.subr.mxu1 %v734_v0  ;;  %658 = vmatpush3.msra.mxu0 %v33_v9  ;;  %v148_v28 = vsel %vm43_vm0, %v146_v20, 0.0  ;;  %v151_v32 = vsel %vm43_vm0, %v147_v30, 0.0  ;;  %v285_v44 = vld [vmem:[%s932_s3] sm:$0xff]  ;;  %v180_v30 = vsub.s32 3, %v881_v54 }
   0xb   :  { %678 = vmatpush3.msra.mxu1 %v193_v10  ;;  %659 = vmatprep.subr.mxu0 %v734_v0  ;;  %v132_v35 = vsel %vm43_vm0, %v130_v33, 0.0  ;;  %v135_v36 = vsel %vm43_vm0, %v131_v34, 0.0  ;;  %v888_v63 = vld [vmem:[%s933_s5] sm:$0xff]  ;;  %v186_v34 = vsub.s32 4, %v881_v54 }
   0xc   :  { %679 = vmatprep.subr.mxu1 %v734_v0  ;;  %660 = vmatpush3.msra.mxu0 %v32_v13  ;;  %v171_v2 = vrot.slane %v888_v63, %v170_v59  ;;  %v201_v3 = vrot.slane %v888_v63, %v200_v60  ;;  %v459_v33 = vrot.slane %v888_v63, %v458_v29 }
   0xd   :  { %680 = vmatpush3.msra.mxu1 %v192_v14  ;;  %661 = vmatprep.subr.mxu0 %v734_v0 }
   0xe   :  { %681 = vmatprep.subr.mxu1 %v734_v0  ;;  %662 = vmatpush3.msra.mxu0 %v31_v17 }
   0xf   :  { %682 = vmatpush3.msra.mxu1 %v191_v18  ;;  %663 = vmatprep.subr.mxu0 %v734_v0 }
  0x10   :  { %683 = vmatprep.subr.mxu1 %v734_v0  ;;  %664 = vmatpush3.msra.mxu0 %v30_v23 }
  0x11   :  { %684 = vmatpush3.msra.mxu1 %v190_v24  ;;  %685 = vmatprep.mubr.msk.bf16.mxu1 %vm735_vm1, %v734_v0 }
  0x12   :  { %666 = vmatmul.mubr.msk.bf16.vlgmr.msra.gmra.mxu0 %vm43_vm0, %v724_v25  ;;  %686 = vmatmul.mubr.msk.bf16.vlgmr.msra.gmra.mxu1 %vm43_vm0, %v725_v26  ;;  %v494_v25 = vld [vmem:[%s934_s4 + $0x18] sm:$0xff]  ;;  %v493_v26 = vld [vmem:[%s934_s4 + $0x10] sm:$0xff] }
  0x13   :  { %141 = vadd.xlane.f32.xlu0 %v140_v27  ;;  %149 = vadd.xlane.f32.xlu1 %v148_v28  ;;  %v492_v27 = vld [vmem:[%s934_s4 + $0x8] sm:$0xff]  ;;  %v491_v28 = vld [vmem:[%s934_s4] sm:$0xff] }
  0x14   :  { %689 = vmatprep.subr.mxu0 %v292_v37  ;;  %700 = vmatprep.subr.mxu1 %v288_v38 }
  0x15   :  { %690 = vmatpush3.msra.mxu0 %v292_v37  ;;  %701 = vmatpush3.msra.mxu1 %v288_v38 }
  0x16   :  { %691 = vmatprep.subr.mxu0 %v291_v39  ;;  %702 = vmatprep.subr.mxu1 %v287_v40 }
  0x17   :  { %144 = vadd.xlane.f32.xlu0 %v143_v31  ;;  %152 = vadd.xlane.f32.xlu1 %v151_v32  ;;  %v464_v31 = vsub.s32 5, %v881_v54 }
  0x18   :  { %692 = vmatpush3.msra.mxu0 %v291_v39  ;;  %703 = vmatpush3.msra.mxu1 %v287_v40  ;;  %v470_v39 = vsub.s32 6, %v881_v54 }
  0x19   :  { %693 = vmatprep.subr.mxu0 %v290_v41  ;;  %704 = vmatprep.subr.mxu1 %v286_v42  ;;  %v465_v38 = vrot.slane %v888_v63, %v464_v31 }
  0x1a   :  { %694 = vmatpush3.msra.mxu0 %v290_v41  ;;  %705 = vmatpush3.msra.mxu1 %v286_v42 }
  0x1b   :  { %133 = vadd.xlane.f32.xlu0 %v132_v35  ;;  %136 = vadd.xlane.f32.xlu1 %v135_v36  ;;  %v181_v36 = vrot.slane %v888_v63, %v180_v30 }
  0x1c   :  { %695 = vmatprep.subr.mxu0 %v289_v43  ;;  %706 = vmatprep.subr.mxu1 %v285_v44 }
  0x1d   :  { %696 = vmatpush3.msra.mxu0 %v289_v43  ;;  %707 = vmatpush3.msra.mxu1 %v285_v44  ;;  %v187_v44 = vrot.slane %v888_v63, %v186_v34 }
  0x1e   :  { %711 = vmatprep.subr.mxu0 %v494_v25 }
  0x9c   :  { %v142_v45 = vpop.xlane.xlu0 %141  ;;  %v150_v46 = vpop.xlane.xlu1 %149 }
  0x9d   :  { %v154_v47 = vmax.f32 %v142_v45, 1e-16  ;;  %v160_v49 = vmax.f32 %v150_v46, 1e-16 }
  0x9f   :  { %726 = vrsqrt.f32 %v154_v47  ;;  %v471_v47 = vrot.slane %v888_v63, %v470_v39 }
  0xa0   :  { %v145_v48 = vpop.xlane.xlu0 %144  ;;  %v153_v51 = vpop.xlane.xlu1 %152  ;;  %728 = vrsqrt.f32 %v160_v49 }
  0xa1   :  { %v155_v50 = vmax.f32 %v145_v48, 1e-16  ;;  %v161_v52 = vmax.f32 %v153_v51, 1e-16 }
  0xa3   :  { %730 = vrsqrt.f32 %v155_v50 }
  0xa4   :  { %732 = vrsqrt.f32 %v161_v52  ;;  %v134_v56 = vpop.xlane.xlu0 %133  ;;  %v137_v62 = vpop.xlane.xlu1 %136 }
  0xac   :  { %v727_v55 = vpop.eup %726 }
  0xad   :  { %v729_v57 = vpop.eup %728  ;;  %v158_v58 = vmul.f32 %v727_v55, %v134_v56 }
  0xaf   :  { %v164_v0 = vmul.f32 %v729_v57, %v158_v58  ;;  %v497_v57 = vsub.s32 7, %v881_v54 }
  0xb0   :  { %v731_v61 = vpop.eup %730 }
  0xb1   :  { %v159_v1 = vmul.f32 %v731_v61, %v137_v62  ;;  %v733_v4 = vpop.eup %732  ;;  %v498_v58 = vrot.slane %v888_v63, %v497_v57 }
  0xb3   :  { %v165_v10 = vmul.f32 %v733_v4, %v159_v1 }
  0xd2   :  { %v113_v5 = vpop.f32.mrf.mxu0  ;;  %v276_v6 = vpop.f32.mrf.mxu1 }
  0xd3   :  { %v166_v7 = vmul.f32 %v164_v0, %v113_v5  ;;  %v176_v8 = vadd.f32 %v171_v2, %v113_v5  ;;  %v277_v9 = vadd.f32 %v276_v6, %v201_v3 }
  0xd4   :  { %v667_v11 = vpop.f32.mrf.mxu0  ;;  %v687_v12 = vpop.f32.mrf.mxu1 }
  0xd5   :  { %v172_v13 = vadd.f32 %v171_v2, %v166_v7  ;;  %v283_v14 = vmax.f32 %v277_v9, 0.0  ;;  %v182_v45 = vmul.f32 %v181_v36, %v176_v8 }
  0xd6   :  { %v116_v15 = vpop.f32.mrf.mxu0  ;;  %v279_v16 = vpop.f32.mrf.mxu1 }
  0xd7   :  { %v174_v17 = vmax.f32 %v172_v13, 0.0  ;;  %v167_v18 = vmul.f32 %v165_v10, %v116_v15  ;;  %v280_v19 = vadd.f32 %v279_v16, %v201_v3  ;;  %697 = vmatprep.mubr.msk.f32.mxu0 %vm293_vm2, %v283_v14  ;;  %v188_v50 = vadd.f32 %v187_v44, %v182_v45 }
  0xd8   :  { %v668_v20 = vpop.f32.mrf.mxu0  ;;  %v688_v21 = vpop.f32.mrf.mxu1 }
  0xd9   :  { %v173_v22 = vadd.f32 %v171_v2, %v167_v18  ;;  %v284_v23 = vmax.f32 %v280_v19, 0.0  ;;  %708 = vmatprep.mubr.msk.f32.mxu1 %vm293_vm2, %v174_v17 }
  0xdb   :  { %v175_v24 = vmax.f32 %v173_v22, 0.0  ;;  %698 = vmatmul.mubr.msk.f32.vlgmr.msra.gmra.mxu0 %vm293_vm2, %v284_v23 }
  0xdc   :  { %712 = vmatpush3.msra.mxu0 %v494_v25 }
  0xdd   :  { %709 = vmatmul.mubr.msk.f32.vlgmr.msra.gmra.mxu1 %vm293_vm2, %v175_v24  ;;  %713 = vmatprep.subr.mxu0 %v493_v26 }
  0xde   :  { %714 = vmatpush3.msra.mxu0 %v493_v26 }
  0xdf   :  { %715 = vmatprep.subr.mxu0 %v492_v27 }
  0xe0   :  { %716 = vmatpush3.msra.mxu0 %v492_v27 }
  0xe1   :  { %717 = vmatprep.subr.mxu0 %v491_v28 }
  0xe2   :  { %718 = vmatpush3.msra.mxu0 %v491_v28 }
 0x19b   :  { %v699_v32 = vpop.f32.mrf.mxu0 }
 0x19d   :  { %v710_v35 = vpop.f32.mrf.mxu1  ;;  %v366_v40 = vpop.f32.mrf.mxu0 }
 0x19e   :  { %v453_v37 = vadd.f32 %v710_v35, %v699_v32 }
 0x19f   :  { %v447_v41 = vpop.f32.mrf.mxu1 }
 0x1a0   :  { %v461_v42 = vadd.f32 %v459_v33, %v453_v37  ;;  %v448_v43 = vadd.f32 %v447_v41, %v366_v40 }
 0x1a2   :  { %v467_v46 = vmul.f32 %v465_v38, %v461_v42  ;;  %v460_v48 = vadd.f32 %v459_v33, %v448_v43 }
 0x1a4   :  { %v466_v49 = vmul.f32 %v465_v38, %v460_v48  ;;  %v473_v51 = vadd.f32 %v471_v47, %v467_v46 }
 0x1a6   :  { %v472_v52 = vadd.f32 %v471_v47, %v466_v49  ;;  %v490_v56 = vmax.f32 %v473_v51, 0.0 }
 0x1a8   :  { %v487_v53 = vsel %vm481_vm3, %v188_v50, %v472_v52 }
 0x1a9   :  { %v489_v55 = vmax.f32 %v487_v53, 0.0 }
 0x1ab   :  { %719 = vmatprep.mubr.msk.f32.mxu0 %vm293_vm2, %v489_v55 }
 0x1ac   :  { %720 = vmatmul.mubr.msk.f32.vlgmr.msra.gmra.mxu0 %vm293_vm2, %v490_v56 }
 0x26c   :  { %v721_v59 = vpop.f32.mrf.mxu0 }
 0x26d   :  { %v577_v60 = vadd.f32 %v721_v59, %v498_v58 }
 0x26e   :  { %v571_v61 = vpop.f32.mrf.mxu0 }
 0x26f   :  { %582 = vst.msk [vmem:[%s935_s6 + $0x8] sm:$0xff] %vm580_vm4, %v577_v60  ;;  %v572_v62 = vadd.f32 %v571_v61, %v498_v58 }
 0x271   :  { %581 = vst.msk [vmem:[%s935_s6] sm:$0xff] %vm580_vm4, %v572_v62 }

</bundles_post_ra>
